<compile_context>
chip_gen: v6e
topology: v6e:2x2x1
jax: 0.10.0
libtpu: 0.0.40
codegen_flags: <defaults>
</compile_context>

<pallas_src>
import functools

import jax
import jax.numpy as jnp
from jax.experimental import pallas as pl
from jax.experimental.pallas import tpu as pltpu


_VMEM = pl.BlockSpec(memory_space=pltpu.MemorySpace.VMEM)
_LANE = 128


def _round_up(v, m):
    return ((v + m - 1) // m) * m


# ----------------------------------------------------------------------------
# Fused Pallas kernel: GCNConv -> ReLU -> GCNConv -> global_max_pool -> fc ->
# log_softmax, all in one body (everything resident in VMEM).
# ----------------------------------------------------------------------------
def _gcnnet_kernel(a_ref, x_ref, batch_ref, wslab_ref, fslab_ref, o_ref, *,
                   num_graphs, num_feature, hidden, fc_hidden, num_classes):
    a = a_ref[...]                                   # (N, N) bf16: binary A+I

    # ---- deg^-1/2 in-kernel (f32 accumulation of the 0/1 rows, then rsqrt)
    deg = jnp.sum(a.astype(jnp.float32), axis=1, keepdims=True)    # (N, 1)
    d = jax.lax.rsqrt(deg)                                         # deg >= 1

    # ---- static slab views (sublane-aligned offsets; static slices are free)
    w2_row = _round_up(num_feature, 16)              # bf16 sublane tile = 16
    w1 = wslab_ref[0:num_feature, 0:hidden]                       # (F_in, H) bf16
    w2 = wslab_ref[w2_row:w2_row + hidden, 0:hidden]              # (H, H)    bf16

    fc1_row = 8
    fc2_row = 8 + _round_up(hidden, 8)
    b1 = fslab_ref[0:1, 0:hidden]                                 # (1, H)   f32
    b2 = fslab_ref[1:2, 0:hidden]                                 # (1, H)
    fb1 = fslab_ref[2:3, 0:fc_hidden]                             # (1, 64)
    fb2 = fslab_ref[3:4, 0:num_classes]                           # (1, C)
    fw1 = fslab_ref[fc1_row:fc1_row + hidden, 0:fc_hidden]        # (H, 64)
    fw2 = fslab_ref[fc2_row:fc2_row + fc_hidden, 0:num_classes]   # (64, C)

    # ---- GCNConv layer 1 (F_in < F_out): (A_hat @ X) @ W1 + b1, fused ReLU
    x = x_ref[...]                                                # (N, F_in) f32
    xs = (x * d).astype(jnp.bfloat16)                             # D^-1/2 X
    ax = jnp.dot(a, xs, preferred_element_type=jnp.float32) * d   # D^-1/2 A D^-1/2 X
    h = jnp.dot(ax.astype(jnp.bfloat16), w1,
                preferred_element_type=jnp.float32) + b1
    h = jnp.maximum(h, 0.0)                                       # ReLU (f32 VPU)

    # ---- GCNConv layer 2 (F_in == F_out): A_hat @ (H @ W2) + b2
    hw = jnp.dot(h.astype(jnp.bfloat16), w2,
                 preferred_element_type=jnp.float32)              # (N, H)
    hw = (hw * d).astype(jnp.bfloat16)
    h2 = jnp.dot(a, hw, preferred_element_type=jnp.float32) * d + b2

    # ---- global_max_pool: static loop over graphs, 2-D masked maxes
    bvec = batch_ref[...]                                         # (N, 1) int32
    neg = jnp.float32(-1e30)      # finite sentinel: empty graph -> -1e30, not NaN
    rows = []
    for g in range(num_graphs):
        masked = jnp.where(bvec == g, h2, neg)                    # (N, H)
        rows.append(jnp.max(masked, axis=0, keepdims=True))       # (1, H)
    pooled = jnp.concatenate(rows, axis=0)                        # (G, H)

    # ---- fc: Linear -> ReLU -> Linear (tiny; kept in f32 for accuracy)
    z = jnp.dot(pooled, fw1, preferred_element_type=jnp.float32) + fb1
    z = jnp.maximum(z, 0.0)
    logits = jnp.dot(z, fw2, preferred_element_type=jnp.float32) + fb2

    # ---- log_softmax(dim=1)
    mx = jnp.max(logits, axis=1, keepdims=True)
    lse = mx + jnp.log(jnp.sum(jnp.exp(logits - mx), axis=1, keepdims=True))
    # (G, C) output is tiny; if C/G grow, switch to a lane-dense (G, 128) slab.
    o_ref[...] = (logits - lse).astype(o_ref.dtype)


# ----------------------------------------------------------------------------
# One-time parameter packing: one bf16 slab (MXU weights) + one f32 slab
# (biases + fc head), both lane-dense (last dim 128), sublane-aligned offsets.
# ----------------------------------------------------------------------------
def pack_params(params):
    num_feature, hidden = params["gcn1_w"].shape
    fc_hidden = params["fc1_w"].shape[1]
    num_classes = params["fc2_w"].shape[1]

    w2_row = _round_up(num_feature, 16)
    wslab = jnp.zeros((w2_row + _round_up(hidden, 16), _LANE), jnp.bfloat16)
    wslab = wslab.at[0:num_feature, 0:hidden].set(params["gcn1_w"].astype(jnp.bfloat16))
    wslab = wslab.at[w2_row:w2_row + hidden, 0:hidden].set(params["gcn2_w"].astype(jnp.bfloat16))

    fc1_row = 8
    fc2_row = 8 + _round_up(hidden, 8)
    fslab = jnp.zeros((fc2_row + _round_up(fc_hidden, 8), _LANE), jnp.float32)
    fslab = fslab.at[0, 0:hidden].set(params["gcn1_b"][0])
    fslab = fslab.at[1, 0:hidden].set(params["gcn2_b"][0])
    fslab = fslab.at[2, 0:fc_hidden].set(params["fc1_b"][0])
    fslab = fslab.at[3, 0:num_classes].set(params["fc2_b"][0])
    fslab = fslab.at[fc1_row:fc1_row + hidden, 0:fc_hidden].set(params["fc1_w"])
    fslab = fslab.at[fc2_row:fc2_row + fc_hidden, 0:num_classes].set(params["fc2_w"])
    return wslab, fslab


# ----------------------------------------------------------------------------
# Glue: binary undirected adjacency + self loops (normalization is in-kernel).
# TODO(synk): the sparse edge_index scatter / to_undirected has no efficient
# Pallas equivalent at this scale; it runs once in XLA glue.
# ----------------------------------------------------------------------------
def build_adj(edge_index, num_nodes):
    src, dst = edge_index[0], edge_index[1]
    a = jnp.zeros((num_nodes, num_nodes), jnp.float32).at[src, dst].set(1.0)
    a = jnp.maximum(a, a.T)                                     # to_undirected
    a = jnp.maximum(a, jnp.eye(num_nodes, dtype=jnp.float32))   # self loops (weight 1)
    return a.astype(jnp.bfloat16)


# ----------------------------------------------------------------------------
# Model: config = [("gcn", 32, 32)], num_feature=8, num_classes=4
# ----------------------------------------------------------------------------
def init_params(key, num_feature=8, hidden=32, num_classes=4):
    ks = jax.random.split(key, 8)
    s = 0.1
    return dict(
        gcn1_w=s * jax.random.normal(ks[0], (num_feature, hidden), jnp.float32),
        gcn1_b=s * jax.random.normal(ks[1], (1, hidden), jnp.float32),
        gcn2_w=s * jax.random.normal(ks[2], (hidden, hidden), jnp.float32),
        gcn2_b=s * jax.random.normal(ks[3], (1, hidden), jnp.float32),
        fc1_w=s * jax.random.normal(ks[4], (hidden, 64), jnp.float32),
        fc1_b=s * jax.random.normal(ks[5], (1, 64), jnp.float32),
        fc2_w=s * jax.random.normal(ks[6], (64, num_classes), jnp.float32),
        fc2_b=s * jax.random.normal(ks[7], (1, num_classes), jnp.float32),
    )


@functools.partial(jax.jit, static_argnames=(
    "num_graphs", "num_feature", "hidden", "fc_hidden", "num_classes"))
def gcnnet_forward(wslab, fslab, x, edge_index, batch, *,
                   num_graphs, num_feature, hidden, fc_hidden, num_classes):
    n = x.shape[0]
    a = build_adj(edge_index, n)
    batch_col = batch.reshape(n, 1).astype(jnp.int32)

    return pl.pallas_call(
        functools.partial(_gcnnet_kernel,
                          num_graphs=num_graphs, num_feature=num_feature,
                          hidden=hidden, fc_hidden=fc_hidden,
                          num_classes=num_classes),
        out_shape=jax.ShapeDtypeStruct((num_graphs, num_classes), jnp.float32),
        in_specs=[_VMEM] * 5,
        out_specs=_VMEM,
    )(a, x, batch_col, wslab, fslab)


# ----------------------------------------------------------------------------
# Pure-JAX f32 reference (same math, no Pallas) for a sanity check.
# ----------------------------------------------------------------------------
def gcnnet_reference(params, x, edge_index, batch, num_graphs):
    n = x.shape[0]
    a = build_adj(edge_index, n).astype(jnp.float32)
    d = jax.lax.rsqrt(jnp.sum(a, axis=1, keepdims=True))
    a_hat = d * a * d.T
    h = jnp.maximum(a_hat @ x @ params["gcn1_w"] + params["gcn1_b"], 0.0)
    h2 = a_hat @ (h @ params["gcn2_w"]) + params["gcn2_b"]
    pooled = jnp.stack([
        jnp.max(jnp.where((batch == g)[:, None], h2, -1e30), axis=0)
        for g in range(num_graphs)], axis=0)
    z = jnp.maximum(pooled @ params["fc1_w"] + params["fc1_b"], 0.0)
    logits = z @ params["fc2_w"] + params["fc2_b"]
    return jax.nn.log_softmax(logits, axis=1)


if __name__ == "__main__":
    key = jax.random.PRNGKey(0)
    k_x, k_p = jax.random.split(key)

    NUM_NODES = 16
    NUM_FEATURE = 8
    HIDDEN = 32
    FC_HIDDEN = 64
    NUM_CLASSES = 4
    NUM_GRAPHS = 2

    # Two graphs of 8 nodes each, ring topology (directed edges; forward
    # symmetrizes via to_undirected just like the PyTorch module).
    src, dst = [], []
    for g in range(NUM_GRAPHS):
        off = g * 8
        for i in range(8):
            src.append(off + i)
            dst.append(off + (i + 1) % 8)
    edge_index = jnp.array([src, dst], dtype=jnp.int32)
    batch = jnp.repeat(jnp.arange(NUM_GRAPHS, dtype=jnp.int32), 8)

    x = jax.random.normal(k_x, (NUM_NODES, NUM_FEATURE), jnp.float32)
    params = init_params(k_p, NUM_FEATURE, HIDDEN, NUM_CLASSES)
    wslab, fslab = pack_params(params)     # packed once; bf16 weights persist

    out = gcnnet_forward(wslab, fslab, x, edge_index, batch,
                         num_graphs=NUM_GRAPHS, num_feature=NUM_FEATURE,
                         hidden=HIDDEN, fc_hidden=FC_HIDDEN,
                         num_classes=NUM_CLASSES)
    out = jax.block_until_ready(out)

    assert out.shape == (NUM_GRAPHS, NUM_CLASSES)
    # log_softmax rows must sum (in prob space) to 1
    assert jnp.allclose(jnp.sum(jnp.exp(out), axis=1), 1.0, atol=1e-3)
    assert jnp.all(jnp.isfinite(out))
    # bf16 MXU path vs f32 reference: loose tolerance for the bf16 casts
    ref = gcnnet_reference(params, x, edge_index, batch, NUM_GRAPHS)
    assert jnp.allclose(out, ref, atol=5e-2, rtol=5e-2)
    print("KERNEL_OK")
</pallas_src>

<mosaic_0001>
module attributes {stable_mosaic.version = 11 : i64} {
  func.func @_gcnnet_kernel(%arg0: memref<16x16xbf16, #tpu.memory_space<vmem>>, %arg1: memref<16x8xf32, #tpu.memory_space<vmem>>, %arg2: memref<16x1xi32, #tpu.memory_space<vmem>>, %arg3: memref<48x128xbf16, #tpu.memory_space<vmem>>, %arg4: memref<104x128xf32, #tpu.memory_space<vmem>>, %arg5: memref<2x4xf32, #tpu.memory_space<vmem>>) attributes {dimension_semantics = [], scalar_prefetch = 0 : i64, scratch_operands = 0 : i64, tpu.core_type = #tpu.core_type<tc>} {
    %c0 = arith.constant 0 : index
    %c0_0 = arith.constant 0 : index
    %0 = vector.load %arg0[%c0, %c0_0] : memref<16x16xbf16, #tpu.memory_space<vmem>>, vector<16x16xbf16>
    %1 = arith.extf %0 : vector<16x16xbf16> to vector<16x16xf32>
    %cst = arith.constant dense<0.000000e+00> : vector<16xf32>
    %2 = vector.multi_reduction <add>, %1, %cst [1] : vector<16x16xf32> to vector<16xf32>
    %3 = vector.shape_cast %2 : vector<16xf32> to vector<16x1xf32>
    %4 = math.rsqrt %3 : vector<16x1xf32>
    %c0_1 = arith.constant 0 : index
    %c0_2 = arith.constant 0 : index
    %5 = vector.load %arg3[%c0_1, %c0_2] : memref<48x128xbf16, #tpu.memory_space<vmem>>, vector<8x32xbf16>
    %c16 = arith.constant 16 : index
    %c0_3 = arith.constant 0 : index
    %6 = vector.load %arg3[%c16, %c0_3] : memref<48x128xbf16, #tpu.memory_space<vmem>>, vector<32x32xbf16>
    %c0_4 = arith.constant 0 : index
    %c0_5 = arith.constant 0 : index
    %7 = vector.load %arg4[%c0_4, %c0_5] : memref<104x128xf32, #tpu.memory_space<vmem>>, vector<1x32xf32>
    %c1 = arith.constant 1 : index
    %c0_6 = arith.constant 0 : index
    %8 = vector.load %arg4[%c1, %c0_6] : memref<104x128xf32, #tpu.memory_space<vmem>>, vector<1x32xf32>
    %c2 = arith.constant 2 : index
    %c0_7 = arith.constant 0 : index
    %9 = vector.load %arg4[%c2, %c0_7] : memref<104x128xf32, #tpu.memory_space<vmem>>, vector<1x64xf32>
    %c3 = arith.constant 3 : index
    %c0_8 = arith.constant 0 : index
    %10 = vector.load %arg4[%c3, %c0_8] : memref<104x128xf32, #tpu.memory_space<vmem>>, vector<1x4xf32>
    %c8 = arith.constant 8 : index
    %c0_9 = arith.constant 0 : index
    %11 = vector.load %arg4[%c8, %c0_9] : memref<104x128xf32, #tpu.memory_space<vmem>>, vector<32x64xf32>
    %c40 = arith.constant 40 : index
    %c0_10 = arith.constant 0 : index
    %12 = vector.load %arg4[%c40, %c0_10] : memref<104x128xf32, #tpu.memory_space<vmem>>, vector<64x4xf32>
    %c0_11 = arith.constant 0 : index
    %c0_12 = arith.constant 0 : index
    %13 = vector.load %arg1[%c0_11, %c0_12] : memref<16x8xf32, #tpu.memory_space<vmem>>, vector<16x8xf32>
    %14 = vector.broadcast %4 : vector<16x1xf32> to vector<16x8xf32>
    %15 = arith.mulf %13, %14 : vector<16x8xf32>
    %16 = arith.truncf %15 : vector<16x8xf32> to vector<16x8xbf16>
    %cst_13 = arith.constant dense<0.000000e+00> : vector<16x8xf32>
    %17 = tpu.matmul %0, %16, %cst_13 {dimension_numbers = #tpu.dot_dimension_numbers<[1], [0], [0], [1], [0, 0, 1, 1], [], []>} : vector<16x16xbf16>, vector<16x8xbf16>, vector<16x8xf32> -> vector<16x8xf32>
    %18 = vector.broadcast %4 : vector<16x1xf32> to vector<16x8xf32>
    %19 = arith.mulf %17, %18 : vector<16x8xf32>
    %20 = arith.truncf %19 : vector<16x8xf32> to vector<16x8xbf16>
    %cst_14 = arith.constant dense<0.000000e+00> : vector<16x32xf32>
    %21 = tpu.matmul %20, %5, %cst_14 {dimension_numbers = #tpu.dot_dimension_numbers<[1], [0], [0], [1], [0, 0, 1, 1], [], []>} : vector<16x8xbf16>, vector<8x32xbf16>, vector<16x32xf32> -> vector<16x32xf32>
    %22 = vector.broadcast %7 : vector<1x32xf32> to vector<16x32xf32>
    %23 = arith.addf %21, %22 : vector<16x32xf32>
    %cst_15 = arith.constant 0.000000e+00 : f32
    %24 = vector.broadcast %cst_15 : f32 to vector<16x32xf32>
    %25 = arith.maximumf %23, %24 : vector<16x32xf32>
    %26 = arith.truncf %25 : vector<16x32xf32> to vector<16x32xbf16>
    %cst_16 = arith.constant dense<0.000000e+00> : vector<16x32xf32>
    %27 = tpu.matmul %26, %6, %cst_16 {dimension_numbers = #tpu.dot_dimension_numbers<[1], [0], [0], [1], [0, 0, 1, 1], [], []>} : vector<16x32xbf16>, vector<32x32xbf16>, vector<16x32xf32> -> vector<16x32xf32>
    %28 = vector.broadcast %4 : vector<16x1xf32> to vector<16x32xf32>
    %29 = arith.mulf %27, %28 : vector<16x32xf32>
    %30 = arith.truncf %29 : vector<16x32xf32> to vector<16x32xbf16>
    %cst_17 = arith.constant dense<0.000000e+00> : vector<16x32xf32>
    %31 = tpu.matmul %0, %30, %cst_17 {dimension_numbers = #tpu.dot_dimension_numbers<[1], [0], [0], [1], [0, 0, 1, 1], [], []>} : vector<16x16xbf16>, vector<16x32xbf16>, vector<16x32xf32> -> vector<16x32xf32>
    %32 = vector.broadcast %4 : vector<16x1xf32> to vector<16x32xf32>
    %33 = arith.mulf %31, %32 : vector<16x32xf32>
    %34 = vector.broadcast %8 : vector<1x32xf32> to vector<16x32xf32>
    %35 = arith.addf %33, %34 : vector<16x32xf32>
    %c0_18 = arith.constant 0 : index
    %c0_19 = arith.constant 0 : index
    %36 = vector.load %arg2[%c0_18, %c0_19] : memref<16x1xi32, #tpu.memory_space<vmem>>, vector<16x1xi32>
    %c0_i32 = arith.constant 0 : i32
    %37 = vector.broadcast %c0_i32 : i32 to vector<16x1xi32>
    %38 = arith.cmpi eq, %36, %37 : vector<16x1xi32>
    %cst_20 = arith.constant -1.000000e+30 : f32
    %39 = vector.shape_cast %38 : vector<16x1xi1> to vector<16x1xi1>
    %40 = vector.broadcast %39 : vector<16x1xi1> to vector<16x32xi1>
    %41 = vector.broadcast %cst_20 : f32 to vector<16x32xf32>
    %42 = arith.select %40, %35, %41 : vector<16x32xi1>, vector<16x32xf32>
    %cst_21 = arith.constant dense<0xFF800000> : vector<32xf32>
    %43 = vector.multi_reduction <maximumf>, %42, %cst_21 [0] : vector<16x32xf32> to vector<32xf32>
    %44 = vector.shape_cast %43 : vector<32xf32> to vector<1x32xf32>
    %c1_i32 = arith.constant 1 : i32
    %45 = vector.broadcast %c1_i32 : i32 to vector<16x1xi32>
    %46 = arith.cmpi eq, %36, %45 : vector<16x1xi32>
    %cst_22 = arith.constant -1.000000e+30 : f32
    %47 = vector.shape_cast %46 : vector<16x1xi1> to vector<16x1xi1>
    %48 = vector.broadcast %47 : vector<16x1xi1> to vector<16x32xi1>
    %49 = vector.broadcast %cst_22 : f32 to vector<16x32xf32>
    %50 = arith.select %48, %35, %49 : vector<16x32xi1>, vector<16x32xf32>
    %cst_23 = arith.constant dense<0xFF800000> : vector<32xf32>
    %51 = vector.multi_reduction <maximumf>, %50, %cst_23 [0] : vector<16x32xf32> to vector<32xf32>
    %52 = vector.shape_cast %51 : vector<32xf32> to vector<1x32xf32>
    %53 = tpu.concatenate %44, %52 in 0 : vector<1x32xf32>, vector<1x32xf32> -> vector<2x32xf32>
    %cst_24 = arith.constant dense<0.000000e+00> : vector<2x64xf32>
    %54 = tpu.matmul %53, %11, %cst_24 {dimension_numbers = #tpu.dot_dimension_numbers<[1], [0], [0], [1], [0, 0, 1, 1], [], []>} : vector<2x32xf32>, vector<32x64xf32>, vector<2x64xf32> -> vector<2x64xf32>
    %55 = vector.broadcast %9 : vector<1x64xf32> to vector<2x64xf32>
    %56 = arith.addf %54, %55 : vector<2x64xf32>
    %cst_25 = arith.constant 0.000000e+00 : f32
    %57 = vector.broadcast %cst_25 : f32 to vector<2x64xf32>
    %58 = arith.maximumf %56, %57 : vector<2x64xf32>
    %cst_26 = arith.constant dense<0.000000e+00> : vector<2x4xf32>
    %59 = tpu.matmul %58, %12, %cst_26 {dimension_numbers = #tpu.dot_dimension_numbers<[1], [0], [0], [1], [0, 0, 1, 1], [], []>} : vector<2x64xf32>, vector<64x4xf32>, vector<2x4xf32> -> vector<2x4xf32>
    %60 = vector.broadcast %10 : vector<1x4xf32> to vector<2x4xf32>
    %61 = arith.addf %59, %60 : vector<2x4xf32>
    %cst_27 = arith.constant dense<0xFF800000> : vector<2xf32>
    %62 = vector.multi_reduction <maximumf>, %61, %cst_27 [1] : vector<2x4xf32> to vector<2xf32>
    %63 = vector.shape_cast %62 : vector<2xf32> to vector<2x1xf32>
    %64 = vector.broadcast %63 : vector<2x1xf32> to vector<2x4xf32>
    %65 = arith.subf %61, %64 : vector<2x4xf32>
    %66 = math.exp %65 : vector<2x4xf32>
    %cst_28 = arith.constant dense<0.000000e+00> : vector<2xf32>
    %67 = vector.multi_reduction <add>, %66, %cst_28 [1] : vector<2x4xf32> to vector<2xf32>
    %68 = vector.shape_cast %67 : vector<2xf32> to vector<2x1xf32>
    %69 = math.log %68 : vector<2x1xf32>
    %70 = arith.addf %63, %69 : vector<2x1xf32>
    %71 = vector.broadcast %70 : vector<2x1xf32> to vector<2x4xf32>
    %72 = arith.subf %61, %71 : vector<2x4xf32>
    %c0_29 = arith.constant 0 : index
    %c0_30 = arith.constant 0 : index
    %73 = vector.load %arg5[%c0_29, %c0_30] : memref<2x4xf32, #tpu.memory_space<vmem>>, vector<2x4xf32>
    tpu.vector_store %arg5[%c0_29, %c0_30], %72 {strides = array<i32>} : memref<2x4xf32, #tpu.memory_space<vmem>>, vector<2x4xf32>,
    return
  }
}

</mosaic_0001>

<bundles_post_ra>
// kernel: gcnnet_forward.1
= control target key start
LH: loop header
LB: loop body
LE: loop exit
PB: predicated region body
PF: predicated region fallthrough
CT: control target
= control target key end

     0   :  { %vm26_vm0 = vcmask 130048   ;;  %s814_s0 = inlined_call_operand.vmem [shape: bf16[16,16], index: 0, kind: input, shape index: {}]   ;;  %s815_s1 = inlined_call_operand.vmem [shape: f32[16,8], index: 1, kind: input, shape index: {}]   ;;  %s816_s2 = inlined_call_operand.vmem [shape: s32[16,1], index: 2, kind: input, shape index: {}]   ;;  %s817_s3 = inlined_call_operand.vmem [shape: bf16[48,128], index: 3, kind: input, shape index: {}]   ;;  %s818_s4 = inlined_call_operand.vmem [shape: f32[104,128], index: 4, kind: input, shape index: {}]   ;;  %s819_s5 = inlined_call_operand.hbm [shape: f32[2,4], index: 5, kind: output, shape index: {}]  }
   0x1   :  { %v682_v0 = vld [vmem:[%s814_s0] sm:$0xff]  }
   0x2   :  { %v24_v1 = vunpack.c.l.bf16 %v682_v0  ;;  %v25_v2 = vunpack.c.h.bf16 %v682_v0 }
   0x3   :  { %10 = vsyncpa [#allocation3], 0  ;;  %v645_v5 = vmov 0.0   ;;  %vm646_vm1 = vmmov 0   ;;  %v56_v9 = vld [vmem:[%s815_s1] sm:$0xff]  ;;  %v57_v10 = vld [vmem:[%s815_s1 + $0x8] sm:$0xff] }
   0x4   :  { %v27_v3 = vsel %vm26_vm0, %v24_v1, 0.0  ;;  %v30_v4 = vsel %vm26_vm0, %v25_v2, 0.0  ;;  %549 = vmatprep.subr.bf16.mxu0 %v645_v5  ;;  %555 = vmatprep.subr.bf16.mxu1 %v645_v5  ;;  %v35_v15 = vld [vmem:[%s817_s3] sm:$0xf]  ;;  %vm121_vm2 = vcmask 1043456   ;;  %vm117_vm3 = vcmask 64512  }
   0x5   :  { %28 = vadd.xlane.f32.xlu0 %v27_v3  ;;  %551 = vmatprep.mubr.msk.bf16.mxu0 %vm646_vm1, %v645_v5  ;;  %v123_v16 = vsel %vm121_vm2, %v35_v15, 0  ;;  %v612_v24 = vld [vmem:[%s817_s3 + $0x10] sm:$0xff]   ;;  %v613_v25 = vld [vmem:[%s817_s3 + $0x8] sm:$0xff]   ;;  %v515_v26 = vld [vmem:[%s818_s4] ss:$0 sm:$0xff]  ;;  %vm181_vm4 = vcmask 261120  }
   0x6   :  { %557 = vmatprep.mubr.msk.bf16.mxu1 %vm646_vm1, %v645_v5  ;;  %556 = vmatpush3.bf16.msra.mxu1 %v123_v16  ;;  %v278_v36 = vld [vmem:[%s816_s2] sm:$0xff]  ;;  %v279_v37 = vld [vmem:[%s816_s2 + $0x8] sm:$0xff]  ;;  %v647_v38 = vmov 0   ;;  %v46_v51 = vld [vmem:[%s818_s4 + $0x18] sm:$0xff]  ;;  %vm326_vm13 = vcmask 1040384   ;;  %vm410_vm14 = vcmask 523264  }
   0x7   :  { %569 = vmatprep.subr.bf16.mxu1 %v645_v5  ;;  %609 = vset.pattern.permute.xlu1 %v647_v38  ;;  %vm280_vm5 = vcmp.eq.s32.totalorder %v278_v36, 0  ;;  %vm281_vm6 = vcmp.eq.s32.totalorder %v279_v37, 0  ;;  %vm303_vm7 = vcmp.eq.s32.totalorder %v278_v36, 1  ;;  %vm304_vm8 = vcmp.eq.s32.totalorder %v279_v37, 1  ;;  %v47_v50 = vld [vmem:[%s818_s4 + $0x20] sm:$0xff]  ;;  %v45_v52 = vld [vmem:[%s818_s4 + $0x10] sm:$0xff] }
   0x8   :  { %610 = vset.pattern.permute.xlu0 %v647_v38  ;;  %v282_v39 = vsel %vm280_vm5, 1, %v647_v38  ;;  %v305_v40 = vsel %vm303_vm7, 1, %v647_v38  ;;  %v283_v41 = vsel %vm281_vm6, 1, %v647_v38  ;;  %v306_v42 = vsel %vm304_vm8, 1, %v647_v38  ;;  %v44_v53 = vld [vmem:[%s818_s4 + $0x8] sm:$0xff]  ;;  %v55_v54 = vld [vmem:[%s818_s4 + $0x60] sm:$0xff] }
   0x9   :  { %31 = vadd.xlane.f32.xlu0 %v30_v4  ;;  %285 = vperm.xlu1 %609, %v282_v39   ;;  %v54_v55 = vld [vmem:[%s818_s4 + $0x58] sm:$0xff]  ;;  %v53_v56 = vld [vmem:[%s818_s4 + $0x50] sm:$0xff]  ;;  %v52_v57 = vld [vmem:[%s818_s4 + $0x48] sm:$0xff]  ;;  %vm484_vm15 = vcmask 25600  }
   0xa   :  { %v51_v58 = vld [vmem:[%s818_s4 + $0x40] sm:$0xff] }
   0xb   :  { %v521_v61 = vld [vmem:[%s818_s4 + $0x1] ss:$0 sm:$0xff] }
   0xd   :  { %288 = vperm.xlu1 %609, %v283_v41  }
  0x11   :  { %311 = vperm.xlu1 %609, %v306_v42  }
  0x1f   :  { %308 = vperm.xlu0 %610, %v305_v40   ;;  %v524_v40 = vld [vmem:[%s818_s4 + $0x3] ss:$0 sm:$0xff] }
  0x84   :  { %v286_v59 = vpop.permute.xlu1 %285 }
  0x85   :  { %vm290_vm10 = vcmp.eq.s32.totalorder %v286_v59, 1 }
  0x88   :  { %v289_v60 = vpop.permute.xlu1 %288 }
  0x89   :  { %vm291_vm11 = vcmp.eq.s32.totalorder %v289_v60, 1 }
  0x8c   :  { %v312_v4 = vpop.permute.xlu1 %311 }
  0x8d   :  { %vm314_vm12 = vcmp.eq.s32.totalorder %v312_v4, 1 }
  0x8e   :  { %v29_v6 = vpop.xlane.xlu0 %28 }
  0x8f   :  { %615 = vrsqrt.f32 %v29_v6 }
  0x92   :  { %v32_v7 = vpop.xlane.xlu0 %31 }
  0x93   :  { %617 = vrsqrt.f32 %v32_v7 }
  0x9c   :  { %v694_v8 = vpop.eup %615 }
  0x9d   :  { %v58_v12 = vmul.f32 %v694_v8, %v56_v9 }
  0xa0   :  { %v702_v11 = vpop.eup %617 }
  0xa1   :  { %v59_v13 = vmul.f32 %v702_v11, %v57_v10 }
  0xa3   :  { %v60_v14 = vpack.c.bf16 %v59_v13, %v58_v12 }
  0xa5   :  { %550 = vmatpush3.bf16.msra.mxu0 %v60_v14 }
  0xa6   :  { %561 = vmatprep.subr.bf16.mxu0 %v645_v5 }
  0xa8   :  { %552 = vmatmul.mubr.msk.bf16.vlgmr.msra.gmra.mxu0 %vm26_vm0, %v682_v0 }
  0xa9   :  { %565 = vmatprep.mubr.msk.bf16.mxu0 %vm646_vm1, %v645_v5  ;;  %562 = vmatpush3.bf16.msra.mxu0 %v612_v24 }
  0xaa   :  { %563 = vmatprep.subr.bf16.mxu0 %v645_v5 }
  0xad   :  { %564 = vmatpush3.bf16.msra.mxu0 %v613_v25 }
  0xae   :  { %575 = vmatprep.subr.mxu0 %v645_v5 }
 0x168   :  { %v103_v17 = vpop.f32.mrf.mxu0 }
 0x169   :  { %v110_v20 = vmul.f32 %v694_v8, %v103_v17 }
 0x16a   :  { %v553_v18 = vpop.f32.mrf.mxu0 }
 0x16c   :  { %v106_v19 = vpop.f32.mrf.mxu0 }
 0x16d   :  { %v111_v21 = vmul.f32 %v702_v11, %v106_v19 }
 0x16e   :  { %v554_v22 = vpop.f32.mrf.mxu0 }
 0x16f   :  { %v112_v23 = vpack.c.bf16 %v111_v21, %v110_v20 }
 0x171   :  { %558 = vmatmul.mubr.msk.bf16.vlgmr.msra.gmra.mxu1 %vm117_vm3, %v112_v23 }
 0x172   :  { %571 = vmatprep.mubr.msk.bf16.mxu1 %vm646_vm1, %v645_v5 }
 0x231   :  { %v159_v27 = vpop.f32.mrf.mxu1 }
 0x232   :  { %v160_v29 = vadd.f32 %v515_v26, %v159_v27 }
 0x233   :  { %v559_v28 = vpop.f32.mrf.mxu1 }
 0x234   :  { %v166_v33 = vmax.f32 %v160_v29, 0.0 }
 0x235   :  { %v162_v30 = vpop.f32.mrf.mxu1 }
 0x236   :  { %v163_v31 = vadd.f32 %v515_v26, %v162_v30 }
 0x237   :  { %v560_v32 = vpop.f32.mrf.mxu1 }
 0x238   :  { %v167_v34 = vmax.f32 %v163_v31, 0.0  ;;  %v50_v32 = vld [vmem:[%s818_s4 + $0x38] sm:$0xff] }
 0x23a   :  { %v168_v35 = vpack.c.bf16 %v167_v34, %v166_v33  ;;  %v49_v33 = vld [vmem:[%s818_s4 + $0x30] sm:$0xff]  ;;  %v48_v34 = vld [vmem:[%s818_s4 + $0x28] sm:$0xff] }
 0x23c   :  { %566 = vmatmul.mubr.msk.bf16.vlgmr.msra.gmra.mxu0 %vm181_vm4, %v168_v35  ;;  %v522_v35 = vld [vmem:[%s818_s4 + $0x2] ss:$0 sm:$0xff]  ;;  %s648_s4 = smov [#allocation2]  }
 0x23d   :  { %583 = vmatprep.mubr.msk.f32.mxu0 %vm646_vm1, %v645_v5  ;;  %576 = vmatpush3.msra.mxu0 %v47_v50  ;;  %s505_s8 = sshll.u32 %s648_s4, 4  ;;  %s506_s8 = int_to_ptr.vmem [resolvable:$true] %s505_s8 }
 0x23e   :  { %577 = vmatprep.subr.mxu0 %v645_v5  ;;  %s623_s9 = scalar_lea.vmem %s506_s8, 32  ;;  %p628_p1 = scmp.lt.s32.totalorder %s506_s8, %s506_s8 }
 0x23f   :  { %578 = vmatpush3.msra.mxu0 %v46_v51  ;;  %p624_p0 = scmp.ne.s32.totalorder %s506_s8, %s623_s9  ;;  %p629_p2 = scmp.lt.s32.totalorder %s623_s9, %s623_s9 }
 0x240   :  { %579 = vmatprep.subr.mxu0 %v645_v5 }
 0x241   :  { %580 = vmatpush3.msra.mxu0 %v45_v52  ;;  %p630_p3 = por %p629_p2, %p628_p1 }
 0x242   :  { %581 = vmatprep.subr.mxu0 %v645_v5 }
 0x243   :  { %582 = vmatpush3.msra.mxu0 %v44_v53  ;;  %p631_p4 = pnand %p630_p3, %p624_p0 }
 0x2fc   :  { %v219_v43 = vpop.f32.mrf.mxu0 }
 0x2fd   :  { %v226_v46 = vmul.f32 %v694_v8, %v219_v43 }
 0x2fe   :  { %v567_v44 = vpop.f32.mrf.mxu0 }
 0x300   :  { %v222_v45 = vpop.f32.mrf.mxu0 }
 0x301   :  { %v227_v47 = vmul.f32 %v702_v11, %v222_v45 }
 0x302   :  { %v568_v48 = vpop.f32.mrf.mxu0 }
 0x303   :  { %v228_v49 = vpack.c.bf16 %v227_v47, %v226_v46 }
 0x305   :  { %570 = vmatpush3.bf16.msra.mxu1 %v228_v49 }
 0x306   :  { %586 = vmatprep.subr.mxu1 %v645_v5 }
 0x308   :  { %572 = vmatmul.mubr.msk.bf16.vlgmr.msra.gmra.mxu1 %vm26_vm0, %v682_v0  ;;  %v309_v0 = vpop.permute.xlu0 %308 }
 0x309   :  { %602 = vmatprep.mubr.msk.f32.mxu1 %vm646_vm1, %v645_v5  ;;  %587 = vmatpush3.msra.mxu1 %v55_v54  ;;  %vm313_vm9 = vcmp.eq.s32.totalorder %v309_v0, 1 }
 0x30a   :  { %588 = vmatprep.subr.mxu1 %v645_v5 }
 0x30b   :  { %589 = vmatpush3.msra.mxu1 %v54_v55 }
 0x30c   :  { %590 = vmatprep.subr.mxu1 %v645_v5 }
 0x30d   :  { %591 = vmatpush3.msra.mxu1 %v53_v56 }
 0x30e   :  { %592 = vmatprep.subr.mxu1 %v645_v5 }
 0x30f   :  { %593 = vmatpush3.msra.mxu1 %v52_v57 }
 0x310   :  { %594 = vmatprep.subr.mxu1 %v645_v5 }
 0x311   :  { %595 = vmatpush3.msra.mxu1 %v51_v58 }
 0x312   :  { %596 = vmatprep.subr.mxu1 %v645_v5 }
 0x313   :  { %597 = vmatpush3.msra.mxu1 %v50_v32 }
 0x314   :  { %598 = vmatprep.subr.mxu1 %v645_v5 }
 0x315   :  { %599 = vmatpush3.msra.mxu1 %v49_v33 }
 0x316   :  { %600 = vmatprep.subr.mxu1 %v645_v5 }
 0x317   :  { %601 = vmatpush3.msra.mxu1 %v48_v34 }
 0x3c8   :  { %v263_v62 = vpop.f32.mrf.mxu1 }
 0x3c9   :  { %v270_v63 = vmul.f32 %v694_v8, %v263_v62 }
 0x3ca   :  { %v573_v1 = vpop.f32.mrf.mxu1 }
 0x3cb   :  { %v276_v2 = vadd.f32 %v521_v61, %v270_v63 }
 0x3cc   :  { %v266_v3 = vpop.f32.mrf.mxu1 }
 0x3cd   :  { %v271_v6 = vmul.f32 %v702_v11, %v266_v3  ;;  %v292_v9 = vsel %vm290_vm10, %v276_v2, -1e+30  ;;  %v315_v10 = vsel %vm313_vm9, %v276_v2, -1e+30 }
 0x3ce   :  { %v574_v7 = vpop.f32.mrf.mxu1  ;;  %v294_v15 = vsel %vm181_vm4, %v292_v9, -inf  ;;  %v317_v8 = vsel %vm181_vm4, %v315_v10, -inf }
 0x3cf   :  { %v277_v12 = vadd.f32 %v521_v61, %v271_v6 }
 0x3d1   :  { %v293_v13 = vsel %vm291_vm11, %v277_v12, -1e+30  ;;  %v316_v14 = vsel %vm314_vm12, %v277_v12, -1e+30 }
 0x3d2   :  { %v295_v16 = vsel %vm181_vm4, %v293_v13, -inf  ;;  %v318_v17 = vsel %vm181_vm4, %v316_v14, -inf }
 0x3d3   :  { %v296_v18 = vmax.f32 %v294_v15, %v295_v16  ;;  %v319_v19 = vmax.f32 %v317_v8, %v318_v17 }
 0x3d5   :  { %v297_v11 = vrot.slane %v296_v18, 4  ;;  %v320_v20 = vrot.slane %v319_v19, 4 }
 0x3d7   :  { %v298_v21 = vmax.f32 %v296_v18, %v297_v11  ;;  %v321_v22 = vmax.f32 %v319_v19, %v320_v20 }
 0x3d9   :  { %v299_v23 = vrot.slane %v298_v21, 2  ;;  %v322_v24 = vrot.slane %v321_v22, 2 }
 0x3db   :  { %v300_v25 = vmax.f32 %v298_v21, %v299_v23  ;;  %v323_v26 = vmax.f32 %v321_v22, %v322_v24 }
 0x3dd   :  { %v301_v27 = vrot.slane %v300_v25, 1  ;;  %v324_v28 = vrot.slane %v323_v26, 1 }
 0x3df   :  { %v302_v29 = vmax.f32 %v300_v25, %v301_v27  ;;  %v325_v30 = vmax.f32 %v323_v26, %v324_v28 }
 0x3e1   :  { %v327_v31 = vsel %vm326_vm13, %v302_v29, %v325_v30 }
 0x3e2   :  { %584 = vmatmul.mubr.msk.f32.vlgmr.msra.gmra.mxu0 %vm181_vm4, %v327_v31 }
 0x4a2   :  { %v401_v36 = vpop.f32.mrf.mxu0 }
 0x4a3   :  { %v402_v37 = vadd.f32 %v522_v35, %v401_v36 }
 0x4a4   :  { %v585_v38 = vpop.f32.mrf.mxu0 }
 0x4a5   :  { %v405_v39 = vmax.f32 %v402_v37, 0.0 }
 0x4a7   :  { %603 = vmatmul.mubr.msk.f32.vlgmr.msra.gmra.mxu1 %vm410_vm14, %v405_v39 }
 0x567   :  { %v480_v5 = vpop.f32.mrf.mxu1 }
 0x568   :  { %v481_v41 = vadd.f32 %v524_v40, %v480_v5 }
 0x569   :  { %v604_v42 = vpop.f32.mrf.mxu1 }
 0x56a   :  { %v485_v43 = vsel %vm484_vm15, %v481_v41, -inf }
 0x56b   :  { %486 = vmax.xlane.f32.xlu1 %v485_v43 }
 0x5f4   :  { %v487_v44 = vpop.xlane.xlu1 %486 }
 0x5f5   :  { %v488_v45 = vsub.f32 %v481_v41, %v487_v44 }
 0x5f7   :  { %v489_v46 = vmul.f32 1.442695, %v488_v45 }
 0x5f9   :  { %619 = vpow2.f32 %v489_v46 }
 0x606   :  { %v620_v47 = vpop.eup %619 }
 0x607   :  { %v491_v48 = vsel %vm484_vm15, %v620_v47, 0.0 }
 0x608   :  { %492 = vadd.xlane.f32.xlu1 %v491_v48 }
 0x691   :  { %v493_v49 = vpop.xlane.xlu1 %492 }
 0x692   :  { %621 = vlog2.f32 %v493_v49 }
 0x69f   :  { %v622_v50 = vpop.eup %621 }
 0x6a0   :  { %v495_v51 = vmul.f32 0.6931472, %v622_v50 }
 0x6a2   :  { %v496_v52 = vadd.f32 %v495_v51, %v487_v44 }
 0x6a4   :  { %v497_v53 = vsub.f32 %v481_v41, %v496_v52 }
 0x6a6   :  { %498 = vst.msk [vmem:[#allocation2] sm:$0x3] %vm484_vm15, %v497_v53 }
 0x6a7   :  { %634 = shalt.err (!%p631_p4)
}
 0x6a8   :  { %508 = dma.vmem_to_hbm [thread:$0]  %s506_s8, 32, %s819_s5, [#allocation3]  }
 0x6a9   :  { %643 = dma.done.wait [#allocation3], 32  }
 0x6aa   :  { %644 = vsyncadd [#allocation3], 4294967264 }
 0x6ab   :  { %512 = vsyncpa [#allocation3], 1 }

</bundles_post_ra>
